<compile_context>
chip_gen: v7x
topology: tpu7x:2x2x1
jax: 0.10.0
libtpu: 0.0.40
codegen_flags: <defaults>
</compile_context>

<pallas_src>
import functools

import jax
import jax.numpy as jnp
from jax.experimental import pallas as pl
from jax.experimental.pallas import tpu as pltpu


# --------------------------------------------------------------------------
# Tiling helpers
# --------------------------------------------------------------------------
def _round_up(x, m):
    return (x + m - 1) // m * m


def _pick_tk(Kp):
    tk = 128
    for cand in (256, 384, 512):
        if Kp % cand == 0:
            tk = cand
    return tk


def _pick_tn(Np):
    return 256 if Np % 256 == 0 else 128


def _pick_tm(M, cap=256):
    Mp8 = _round_up(M, 8)
    tm = cap if Mp8 >= cap else Mp8
    Mp = _round_up(M, tm)
    return tm, Mp


# --------------------------------------------------------------------------
# GEMM kernels (bf16 inputs, f32 accumulation on the MXU)
# --------------------------------------------------------------------------
def _gemm_stats_kernel(x_ref, w_ref, o_ref, s1_ref, s2_ref, acc_ref):
    """y = x @ w ; also per-tile column sum / sum-of-squares for BatchNorm."""
    @pl.when(pl.program_id(2) == 0)
    def _():
        acc_ref[...] = jnp.zeros_like(acc_ref)

    acc_ref[...] += jnp.dot(x_ref[...], w_ref[...],
                            preferred_element_type=jnp.float32)

    @pl.when(pl.program_id(2) == pl.num_programs(2) - 1)
    def _():
        y = acc_ref[...]
        o_ref[...] = y
        s1_ref[...] = jnp.broadcast_to(
            jnp.sum(y, axis=0, keepdims=True), s1_ref.shape)
        s2_ref[...] = jnp.broadcast_to(
            jnp.sum(y * y, axis=0, keepdims=True), s2_ref.shape)


def _gemm_bias_kernel(x_ref, w_ref, b_ref, o_ref, acc_ref):
    """y = x @ w + bias (per-column)."""
    @pl.when(pl.program_id(2) == 0)
    def _():
        acc_ref[...] = jnp.zeros_like(acc_ref)

    acc_ref[...] += jnp.dot(x_ref[...], w_ref[...],
                            preferred_element_type=jnp.float32)

    @pl.when(pl.program_id(2) == pl.num_programs(2) - 1)
    def _():
        o_ref[...] = acc_ref[...] + b_ref[...]


def _conv_gemm(patches, w_pad):
    """patches: (M, K) bf16 ; w_pad: (Kp, Np) bf16 (pre-padded).
    Returns y (Mp, Np) f32 and per-M-tile column sum / sumsq (gm*8, Np) f32."""
    M, K = patches.shape
    Kp, Np = w_pad.shape
    tm, Mp = _pick_tm(M)
    tn = _pick_tn(Np)
    tk = _pick_tk(Kp)
    if (Mp, Kp) != (M, K):                       # skip pad when tile-aligned
        patches = jnp.pad(patches, ((0, Mp - M), (0, Kp - K)))
    gm, gn, gk = Mp // tm, Np // tn, Kp // tk

    y, s1, s2 = pl.pallas_call(
        _gemm_stats_kernel,
        out_shape=(jax.ShapeDtypeStruct((Mp, Np), jnp.float32),
                   jax.ShapeDtypeStruct((gm * 8, Np), jnp.float32),
                   jax.ShapeDtypeStruct((gm * 8, Np), jnp.float32)),
        grid=(gm, gn, gk),
        in_specs=[pl.BlockSpec((tm, tk), lambda i, j, k: (i, k)),
                  pl.BlockSpec((tk, tn), lambda i, j, k: (k, j))],
        out_specs=(pl.BlockSpec((tm, tn), lambda i, j, k: (i, j)),
                   pl.BlockSpec((8, tn), lambda i, j, k: (i, j)),
                   pl.BlockSpec((8, tn), lambda i, j, k: (i, j))),
        scratch_shapes=[pltpu.VMEM((tm, tn), jnp.float32)],
        compiler_params=pltpu.CompilerParams(
            dimension_semantics=("parallel", "parallel", "arbitrary")),
    )(patches, w_pad)
    return y, s1, s2


@jax.jit
def pallas_linear(x, w_pad, b_pad):
    """x: (B, K) f32 ; w_pad: (Kp, Np) bf16 ; b_pad: (1, Np) f32 -> (Mp, Np) f32."""
    B, K = x.shape
    Kp, Np = w_pad.shape
    tm, Mp = _pick_tm(B)
    tn = _pick_tn(Np)
    tk = _pick_tk(Kp)
    xp = x.astype(jnp.bfloat16)
    if (Mp, Kp) != (B, K):
        xp = jnp.pad(xp, ((0, Mp - B), (0, Kp - K)))

    return pl.pallas_call(
        _gemm_bias_kernel,
        out_shape=jax.ShapeDtypeStruct((Mp, Np), jnp.float32),
        grid=(Mp // tm, Np // tn, Kp // tk),
        in_specs=[pl.BlockSpec((tm, tk), lambda i, j, k: (i, k)),
                  pl.BlockSpec((tk, tn), lambda i, j, k: (k, j)),
                  pl.BlockSpec((1, tn), lambda i, j, k: (0, j))],
        out_specs=pl.BlockSpec((tm, tn), lambda i, j, k: (i, j)),
        scratch_shapes=[pltpu.VMEM((tm, tn), jnp.float32)],
        compiler_params=pltpu.CompilerParams(
            dimension_semantics=("parallel", "parallel", "arbitrary")),
    )(xp, w_pad, b_pad)


# --------------------------------------------------------------------------
# Tiled BN-affine (+ optional residual) (+ optional ReLU) -> bf16 activation
# --------------------------------------------------------------------------
def _affine_kernel(y_ref, s_ref, b_ref, o_ref, *, relu):
    out = y_ref[...] * s_ref[...] + b_ref[...]
    if relu:
        out = jnp.maximum(out, 0.0)
    o_ref[...] = out.astype(o_ref.dtype)


def _affine_res_kernel(y_ref, s_ref, b_ref, r_ref, o_ref, *, relu):
    out = y_ref[...] * s_ref[...] + b_ref[...] + r_ref[...].astype(jnp.float32)
    if relu:
        out = jnp.maximum(out, 0.0)
    o_ref[...] = out.astype(o_ref.dtype)


@functools.partial(jax.jit, static_argnames=("relu",))
def pallas_affine(y, scale, shift, *, relu, residual=None):
    M, C = y.shape
    s = scale.reshape(1, C).astype(jnp.float32)
    b = shift.reshape(1, C).astype(jnp.float32)
    tm = M if (M % 8 != 0) else min(256, M)
    grid = (pl.cdiv(M, tm),)
    row_spec = pl.BlockSpec((tm, C), lambda i: (i, 0))
    vec_spec = pl.BlockSpec((1, C), lambda i: (0, 0))

    if residual is None:
        kern = functools.partial(_affine_kernel, relu=relu)
        args = (y, s, b)
        in_specs = [row_spec, vec_spec, vec_spec]
    else:
        kern = functools.partial(_affine_res_kernel, relu=relu)
        args = (y, s, b, residual)
        in_specs = [row_spec, vec_spec, vec_spec, row_spec]

    return pl.pallas_call(
        kern,
        out_shape=jax.ShapeDtypeStruct((M, C), jnp.bfloat16),
        grid=grid,
        in_specs=in_specs,
        out_specs=row_spec,
        compiler_params=pltpu.CompilerParams(
            dimension_semantics=("parallel",)),
    )(*args)


# --------------------------------------------------------------------------
# 3x3 / stride-2 / pad-1 max pool (PyTorch MaxPool2d(3, 2, 1)), tiled over M
# --------------------------------------------------------------------------
def _maxpool_kernel(x_ref, o_ref):
    o_ref[...] = jnp.max(x_ref[...], axis=0)


@jax.jit
def pallas_maxpool3x3s2(x):          # x: NHWC bf16
    N, H, W, C = x.shape
    OH = (H + 2 - 3) // 2 + 1
    OW = (W + 2 - 3) // 2 + 1
    # padding ignored by max (every 3x3 window has >=1 real element)
    xp = jnp.pad(x, ((0, 0), (1, 1), (1, 1), (0, 0)),
                 constant_values=-3.0e38)
    cols = [xp[:, i:i + 2 * OH:2, j:j + 2 * OW:2, :]
            for i in range(3) for j in range(3)]
    wins = jnp.stack(cols, axis=0).reshape(9, N * OH * OW, C)
    M = N * OH * OW
    tm = M if (M % 8 != 0) else min(512, M)

    out = pl.pallas_call(
        _maxpool_kernel,
        out_shape=jax.ShapeDtypeStruct((M, C), x.dtype),
        grid=(pl.cdiv(M, tm),),
        in_specs=[pl.BlockSpec((9, tm, C), lambda i: (0, i, 0))],
        out_specs=pl.BlockSpec((tm, C), lambda i: (i, 0)),
        compiler_params=pltpu.CompilerParams(
            dimension_semantics=("parallel",)),
    )(wins)
    return out.reshape(N, OH, OW, C)


# --------------------------------------------------------------------------
# Global average pool (F.avg_pool2d(x, W) with H == W) -> (N, C) f32
# --------------------------------------------------------------------------
def _avgpool_kernel(x_ref, o_ref):
    o_ref[...] = jnp.mean(x_ref[...].astype(jnp.float32), axis=1)


@jax.jit
def pallas_global_avgpool(x):        # x: NHWC bf16 (module implies H == W)
    N, H, W, C = x.shape
    xr = x.reshape(N, H * W, C)
    tn = N if (N % 8 != 0) else min(8, N)
    return pl.pallas_call(
        _avgpool_kernel,
        out_shape=jax.ShapeDtypeStruct((N, C), jnp.float32),
        grid=(pl.cdiv(N, tn),),
        in_specs=[pl.BlockSpec((tn, H * W, C), lambda i: (i, 0, 0))],
        out_specs=pl.BlockSpec((tn, C), lambda i: (i, 0)),
        compiler_params=pltpu.CompilerParams(
            dimension_semantics=("parallel",)),
    )(xr)


# --------------------------------------------------------------------------
# Conv (im2col + Pallas GEMM w/ fused stats) + BN(batch stats)/residual/ReLU
# --------------------------------------------------------------------------
def _im2col(x, kh, kw, stride, pad):
    N, H, W, C = x.shape
    OH = (H + 2 * pad - kh) // stride + 1
    OW = (W + 2 * pad - kw) // stride + 1
    if pad > 0:
        x = jnp.pad(x, ((0, 0), (pad, pad), (pad, pad), (0, 0)))
    if kh == 1 and kw == 1:
        if stride > 1:
            x = x[:, ::stride, ::stride, :]
        return x.reshape(N * OH * OW, C), OH, OW
    # TODO(synk): fold the kh*kw taps into the GEMM K grid axis (manual DMA of
    # shifted activation tiles) to avoid materializing the 9x patch matrix.
    cols = [x[:, i:i + stride * OH:stride, j:j + stride * OW:stride, :]
            for i in range(kh) for j in range(kw)]
    patches = jnp.stack(cols, axis=3)            # (N, OH, OW, kh*kw, C)
    return patches.reshape(N * OH * OW, kh * kw * C), OH, OW


@functools.partial(jax.jit,
                   static_argnames=("kh", "kw", "stride", "pad", "relu", "cout"))
def conv_bn_act(x, w_pad, gamma, beta, *, kh, kw, stride, pad, relu, cout,
                residual=None, eps=1e-5):
    """x: NHWC bf16; w_pad: (Kp, Np) bf16; returns NHWC bf16."""
    N = x.shape[0]
    patches, OH, OW = _im2col(x, kh, kw, stride, pad)        # (M, K) bf16
    M = N * OH * OW
    Np = w_pad.shape[1]

    y_pad, s1, s2 = _conv_gemm(patches, w_pad)

    # Batch statistics from fused per-tile column sums (tiny per-channel math).
    tot = jnp.sum(s1.reshape(-1, 8, Np)[:, 0, :cout], axis=0)
    tot2 = jnp.sum(s2.reshape(-1, 8, Np)[:, 0, :cout], axis=0)
    mean = tot / M
    var = jnp.maximum(tot2 / M - mean * mean, 0.0)
    scale = gamma * jax.lax.rsqrt(var + eps)
    shift = beta - mean * scale

    y = y_pad[:M, :cout]
    res = None if residual is None else residual.reshape(M, cout)
    out = pallas_affine(y, scale, shift, relu=relu, residual=res)
    return out.reshape(N, OH, OW, cout)


# --------------------------------------------------------------------------
# Parameters (deterministic, shapes from ResNet50_pre / Bottleneck_50).
# Conv weights pre-reshaped to (kh*kw*cin, cout), zero-padded to the GEMM tile
# grid and cast to bf16 once at init.
# --------------------------------------------------------------------------
def _prep_conv_w(w_raw):
    kh, kw, cin, cout = w_raw.shape
    K = kh * kw * cin
    Kp = _round_up(K, 128)
    Np = _round_up(cout, 128)
    w = w_raw.reshape(K, cout)
    w = jnp.pad(w, ((0, Kp - K), (0, Np - cout))).astype(jnp.bfloat16)
    return {"w": w, "kh": kh, "kw": kw, "cout": cout}


def init_params(key, num_classes=1000):
    cnt = [0]

    def nk():
        cnt[0] += 1
        return jax.random.fold_in(key, cnt[0])

    def conv(kh, kw, cin, cout):
        std = (2.0 / (kh * kw * cout)) ** 0.5      # kaiming_normal, fan_out, relu
        w = std * jax.random.normal(nk(), (kh, kw, cin, cout), jnp.float32)
        return _prep_conv_w(w)

    def bn(c):
        return {"g": jnp.ones((c,), jnp.float32), "b": jnp.zeros((c,), jnp.float32)}

    params = {"conv1": conv(7, 7, 3, 64), "bn1": bn(64)}
    inplanes = 64
    layer_cfg = [(64, 3, 1), (128, 4, 2), (256, 6, 2), (512, 3, 2)]
    all_layers = []
    for planes, blocks, stride in layer_cfg:
        blks = []
        for bi in range(blocks):
            s = stride if bi == 0 else 1
            width = planes
            outp = planes * 4
            blk = {"stride": s,
                   "c1": conv(1, 1, inplanes, width), "bn1": bn(width),
                   "c2": conv(3, 3, width, width), "bn2": bn(width),
                   "c3": conv(1, 1, width, outp), "bn3": bn(outp)}
            if s != 1 or inplanes != outp:
                blk["cd"] = conv(1, 1, inplanes, outp)
                blk["bnd"] = bn(outp)
            blks.append(blk)
            inplanes = outp
        all_layers.append(blks)
    params["layers"] = all_layers

    fan_in = 512 * 4
    bound = 1.0 / (fan_in ** 0.5)
    fc_w = jax.random.uniform(nk(), (fan_in, num_classes), jnp.float32, -bound, bound)
    fc_b = jax.random.uniform(nk(), (num_classes,), jnp.float32, -bound, bound)
    Np = _round_up(num_classes, 128)
    params["fc_w"] = jnp.pad(fc_w, ((0, 0), (0, Np - num_classes))).astype(jnp.bfloat16)
    params["fc_b"] = jnp.pad(fc_b.reshape(1, num_classes), ((0, 0), (0, Np - num_classes)))
    params["num_classes"] = num_classes
    return params


# --------------------------------------------------------------------------
# Forward pass (matches ResNet50_pre._forward_impl, feat=True)
# --------------------------------------------------------------------------
def _bottleneck(x, blk):
    s = blk["stride"]
    c1, c2, c3 = blk["c1"], blk["c2"], blk["c3"]
    out = conv_bn_act(x, c1["w"], blk["bn1"]["g"], blk["bn1"]["b"],
                      kh=1, kw=1, stride=1, pad=0, relu=True, cout=c1["cout"])
    out = conv_bn_act(out, c2["w"], blk["bn2"]["g"], blk["bn2"]["b"],
                      kh=3, kw=3, stride=s, pad=1, relu=True, cout=c2["cout"])
    if "cd" in blk:
        cd = blk["cd"]
        identity = conv_bn_act(x, cd["w"], blk["bnd"]["g"], blk["bnd"]["b"],
                               kh=1, kw=1, stride=s, pad=0, relu=False,
                               cout=cd["cout"])
    else:
        identity = x
    out = conv_bn_act(out, c3["w"], blk["bn3"]["g"], blk["bn3"]["b"],
                      kh=1, kw=1, stride=1, pad=0, relu=True, cout=c3["cout"],
                      residual=identity)
    return out


def resnet50_forward(params, x_nchw, feat=True):
    # NCHW f32 -> NHWC bf16 activations
    x = jnp.transpose(x_nchw, (0, 2, 3, 1)).astype(jnp.bfloat16)
    c1 = params["conv1"]
    x = conv_bn_act(x, c1["w"], params["bn1"]["g"], params["bn1"]["b"],
                    kh=7, kw=7, stride=2, pad=3, relu=True, cout=c1["cout"])
    x = pallas_maxpool3x3s2(x)
    for blks in params["layers"]:
        for blk in blks:
            x = _bottleneck(x, blk)
    feat_v = pallas_global_avgpool(x)                           # (N, 2048) f32
    B = feat_v.shape[0]
    logits = pallas_linear(feat_v, params["fc_w"], params["fc_b"])
    out = logits[:B, :params["num_classes"]]
    if feat:
        return out, feat_v
    return out


if __name__ == "__main__":
    key = jax.random.PRNGKey(0)
    k_param, k_x = jax.random.split(key)
    params = init_params(k_param, num_classes=1000)
    x = jax.random.normal(k_x, (2, 3, 32, 32), jnp.float32)     # NCHW like PyTorch

    out, feat_v = resnet50_forward(params, x, feat=True)
    out = jax.block_until_ready(out)
    feat_v = jax.block_until_ready(feat_v)

    assert out.shape == (2, 1000) and feat_v.shape == (2, 2048)
    assert jnp.isfinite(out).all() and jnp.isfinite(feat_v).all()
    print("KERNEL_OK")
</pallas_src>

<mosaic_0001>
module attributes {stable_mosaic.version = 11 : i64} {
  func.func @_affine_kernel(%arg0: i32, %arg1: memref<256x64xf32, #tpu.memory_space<vmem>>, %arg2: memref<1x64xf32, #tpu.memory_space<vmem>>, %arg3: memref<1x64xf32, #tpu.memory_space<vmem>>, %arg4: memref<256x64xbf16, #tpu.memory_space<vmem>>) attributes {dimension_semantics = [#tpu.dimension_semantics<parallel>], iteration_bounds = array<i64: 2>, scalar_prefetch = 0 : i64, scratch_operands = 0 : i64, tpu.core_type = #tpu.core_type<tc>, window_params = [{transform_indices = @transform_0, window_bounds = array<i64: 256, 64>}, {pipeline_mode = #tpu.pipeline_mode<synchronous>, transform_indices = @transform_1, window_bounds = array<i64: 1, 64>}, {pipeline_mode = #tpu.pipeline_mode<synchronous>, transform_indices = @transform_2, window_bounds = array<i64: 1, 64>}, {transform_indices = @transform_3, window_bounds = array<i64: 256, 64>}]} {
    %c0 = arith.constant 0 : index
    %c0_0 = arith.constant 0 : index
    %0 = vector.load %arg1[%c0, %c0_0] : memref<256x64xf32, #tpu.memory_space<vmem>>, vector<256x64xf32>
    %c0_1 = arith.constant 0 : index
    %c0_2 = arith.constant 0 : index
    %1 = vector.load %arg2[%c0_1, %c0_2] : memref<1x64xf32, #tpu.memory_space<vmem>>, vector<1x64xf32>
    %2 = vector.broadcast %1 : vector<1x64xf32> to vector<256x64xf32>
    %3 = arith.mulf %0, %2 : vector<256x64xf32>
    %c0_3 = arith.constant 0 : index
    %c0_4 = arith.constant 0 : index
    %4 = vector.load %arg3[%c0_3, %c0_4] : memref<1x64xf32, #tpu.memory_space<vmem>>, vector<1x64xf32>
    %5 = vector.broadcast %4 : vector<1x64xf32> to vector<256x64xf32>
    %6 = arith.addf %3, %5 : vector<256x64xf32>
    %cst = arith.constant 0.000000e+00 : f32
    %7 = vector.broadcast %cst : f32 to vector<256x64xf32>
    %8 = arith.maximumf %6, %7 : vector<256x64xf32>
    %9 = arith.truncf %8 : vector<256x64xf32> to vector<256x64xbf16>
    %c0_5 = arith.constant 0 : index
    %c0_6 = arith.constant 0 : index
    %10 = vector.load %arg4[%c0_5, %c0_6] : memref<256x64xbf16, #tpu.memory_space<vmem>>, vector<256x64xbf16>
    tpu.vector_store %arg4[%c0_5, %c0_6], %9 {strides = array<i32>} : memref<256x64xbf16, #tpu.memory_space<vmem>>, vector<256x64xbf16>,
    return
  }
  func.func @transform_0(%arg0: i32) -> (i32, i32) {
    %c0_i32 = arith.constant 0 : i32
    %c0_i32_0 = arith.constant 0 : i32
    return %arg0, %c0_i32 : i32, i32
  }
  func.func @transform_1(%arg0: i32) -> (i32, i32) {
    %c0_i32 = arith.constant 0 : i32
    %c0_i32_0 = arith.constant 0 : i32
    %c0_i32_1 = arith.constant 0 : i32
    return %c0_i32, %c0_i32_0 : i32, i32
  }
  func.func @transform_2(%arg0: i32) -> (i32, i32) {
    %c0_i32 = arith.constant 0 : i32
    %c0_i32_0 = arith.constant 0 : i32
    %c0_i32_1 = arith.constant 0 : i32
    return %c0_i32, %c0_i32_0 : i32, i32
  }
  func.func @transform_3(%arg0: i32) -> (i32, i32) {
    %c0_i32 = arith.constant 0 : i32
    %c0_i32_0 = arith.constant 0 : i32
    return %arg0, %c0_i32 : i32, i32
  }
}

</mosaic_0001>

<bundles_post_ra>
// kernel: pallas_affine.1
= control target key start
LH: loop header
LB: loop body
LE: loop exit
PB: predicated region body
PF: predicated region fallthrough
CT: control target
= control target key end

     0   :  { %s646_s12 = smov 0   ;;  %s841_s0 = inlined_call_operand.vmem [shape: f32[512,64], index: 0, kind: input, shape index: {}]   ;;  %s842_s1 = inlined_call_operand.vmem [shape: f32[1,64], index: 1, kind: input, shape index: {}]   ;;  %s843_s2 = inlined_call_operand.vmem [shape: f32[1,64], index: 2, kind: input, shape index: {}]   ;;  %s844_s3 = inlined_call_operand.vmem [shape: bf16[512,64], index: 3, kind: output, shape index: {}]  }
   0x1 LB: > { %s533_s13 = sadd.s32 4294967295, %s624_s12   ;;  %p537_p0 = scmp.ge.s32.totalorder %s624_s12, 1  ;;  %s624_s12 = sphi %s646_s12, %s13_s12  }
   0x2   : > { %p138_p1 = scmp.lt.s32.totalorder %s624_s12, 3 }
   0x4   : > { %p139_p2 = pnand %p537_p0, %p138_p1 }
   0x5   : > { %s538_s14 = sshll.u32 (!%p139_p2), %s533_s13, 5  ;;  %v660_v0 = vld [vmem:[%s842_s1] ss:$0 sm:$0xff] (!%p139_p2)  ;;  %vm444_vm0 = vcmask (!%p139_p2), 519168  }
   0x6   : > { %142 = sbr.rel (%p139_p2) target bundleno = 56 (0x38), region = 32  ;;  %p163_p3 = scmp.lt.s32.totalorder (!%p139_p2), %s538_s14, 63  ;;  %v670_v1 = vld [vmem:[%s843_s2] ss:$0 sm:$0xff] (!%p139_p2) }
   0xd   : > { %s846_s14 = smov (!%p163_p3, %s538_s14), 63 }
   0xe   : > { %s539_s15 = sshll.u32 %s846_s14, 3  ;;  %s541_s23 = sshll.u32 %s846_s14, 2 }
   0xf   : > { %s665_s20 = scalar_lea.vmem %s841_s0, %s539_s15  ;;  %s699_s26 = scalar_lea.vmem %s844_s3, %s541_s23 }
  0x10   : > { %v174_v2 = vld [vmem:[%s665_s20] sm:$0xff]  ;;  %v175_v3 = vld [vmem:[%s665_s20 + $0x8] sm:$0xff]  ;;  %v176_v4 = vld [vmem:[%s665_s20 + $0x10] sm:$0xff] }
  0x11   : > { %v213_v5 = vmul.f32 %v660_v0, %v174_v2  ;;  %v214_v6 = vmul.f32 %v660_v0, %v175_v3  ;;  %v215_v7 = vmul.f32 %v660_v0, %v176_v4  ;;  %v177_v8 = vld [vmem:[%s665_s20 + $0x18] sm:$0xff]  ;;  %v178_v9 = vld [vmem:[%s665_s20 + $0x20] sm:$0xff]  ;;  %v179_v10 = vld [vmem:[%s665_s20 + $0x28] sm:$0xff] }
  0x12   : > { %v216_v11 = vmul.f32 %v660_v0, %v177_v8  ;;  %v217_v12 = vmul.f32 %v660_v0, %v178_v9  ;;  %v218_v13 = vmul.f32 %v660_v0, %v179_v10  ;;  %v180_v14 = vld [vmem:[%s665_s20 + $0x30] sm:$0xff]  ;;  %v181_v15 = vld [vmem:[%s665_s20 + $0x38] sm:$0xff]  ;;  %v182_v32 = vld [vmem:[%s665_s20 + $0x40] sm:$0xff] }
  0x13   : > { %v252_v16 = vadd.f32 %v670_v1, %v213_v5  ;;  %v253_v17 = vadd.f32 %v670_v1, %v214_v6  ;;  %v254_v18 = vadd.f32 %v670_v1, %v215_v7  ;;  %v219_v19 = vmul.f32 %v660_v0, %v180_v14  ;;  %v183_v33 = vld [vmem:[%s665_s20 + $0x48] sm:$0xff]  ;;  %v184_v34 = vld [vmem:[%s665_s20 + $0x50] sm:$0xff]  ;;  %v185_v39 = vld [vmem:[%s665_s20 + $0x58] sm:$0xff] }
  0x14   : > { %v255_v20 = vadd.f32 %v670_v1, %v216_v11  ;;  %v256_v21 = vadd.f32 %v670_v1, %v217_v12  ;;  %v257_v22 = vadd.f32 %v670_v1, %v218_v13  ;;  %v220_v23 = vmul.f32 %v660_v0, %v181_v15  ;;  %v186_v40 = vld [vmem:[%s665_s20 + $0x60] sm:$0xff]  ;;  %v187_v41 = vld [vmem:[%s665_s20 + $0x68] sm:$0xff]  ;;  %v188_v46 = vld [vmem:[%s665_s20 + $0x70] sm:$0xff] }
  0x15   : > { %v284_v24 = vmax.f32 %v252_v16, 0.0  ;;  %v285_v25 = vmax.f32 %v253_v17, 0.0  ;;  %v286_v26 = vmax.f32 %v254_v18, 0.0  ;;  %v258_v27 = vadd.f32 %v670_v1, %v219_v19  ;;  %v189_v51 = vld [vmem:[%s665_s20 + $0x78] sm:$0xff]  ;;  %v190_v10 = vld [vmem:[%s665_s20 + $0x80] sm:$0xff]  ;;  %v191_v11 = vld [vmem:[%s665_s20 + $0x88] sm:$0xff] }
  0x16   : > { %v287_v28 = vmax.f32 %v255_v20, 0.0  ;;  %v288_v29 = vmax.f32 %v256_v21, 0.0  ;;  %v289_v30 = vmax.f32 %v257_v22, 0.0  ;;  %v259_v31 = vadd.f32 %v670_v1, %v220_v23  ;;  %v192_v12 = vld [vmem:[%s665_s20 + $0x90] sm:$0xff]  ;;  %v193_v17 = vld [vmem:[%s665_s20 + $0x98] sm:$0xff]  ;;  %v194_v18 = vld [vmem:[%s665_s20 + $0xa0] sm:$0xff] }
  0x17   : > { %v578_v35 = vpack.c.bf16 %v284_v24, %v284_v24  ;;  %v579_v36 = vpack.c.bf16 %v285_v25, %v285_v25  ;;  %v580_v37 = vpack.c.bf16 %v286_v26, %v286_v26  ;;  %v290_v38 = vmax.f32 %v258_v27, 0.0  ;;  %v195_v19 = vld [vmem:[%s665_s20 + $0xa8] sm:$0xff]  ;;  %v196_v24 = vld [vmem:[%s665_s20 + $0xb0] sm:$0xff] }
  0x18   : > { %v581_v42 = vpack.c.bf16 %v287_v28, %v287_v28  ;;  %v582_v43 = vpack.c.bf16 %v288_v29, %v288_v29  ;;  %v583_v44 = vpack.c.bf16 %v289_v30, %v289_v30  ;;  %v291_v45 = vmax.f32 %v259_v31, 0.0  ;;  %v197_v29 = vld [vmem:[%s665_s20 + $0xb8] sm:$0xff] }
  0x19   : > { %445 = vst.msk [vmem:[%s699_s26] sm:$0xf] %vm444_vm0, %v578_v35  ;;  %446 = vst.msk [vmem:[%s699_s26 + $0x4] sm:$0xf] %vm444_vm0, %v579_v36  ;;  %v584_v47 = vpack.c.bf16 %v290_v38, %v290_v38  ;;  %v221_v48 = vmul.f32 %v660_v0, %v182_v32  ;;  %v222_v49 = vmul.f32 %v660_v0, %v183_v33 }
  0x1a   : > { %447 = vst.msk [vmem:[%s699_s26 + $0x8] sm:$0xf] %vm444_vm0, %v580_v37  ;;  %v223_v50 = vmul.f32 %v660_v0, %v184_v34  ;;  %448 = vst.msk [vmem:[%s699_s26 + $0xc] sm:$0xf] %vm444_vm0, %v581_v42  ;;  %v585_v52 = vpack.c.bf16 %v291_v45, %v291_v45  ;;  %v224_v53 = vmul.f32 %v660_v0, %v185_v39 }
  0x1b   : > { %449 = vst.msk [vmem:[%s699_s26 + $0x10] sm:$0xf] %vm444_vm0, %v582_v43  ;;  %450 = vst.msk [vmem:[%s699_s26 + $0x14] sm:$0xf] %vm444_vm0, %v583_v44  ;;  %v225_v54 = vmul.f32 %v660_v0, %v186_v40  ;;  %v226_v55 = vmul.f32 %v660_v0, %v187_v41  ;;  %v260_v56 = vadd.f32 %v670_v1, %v221_v48 }
  0x1c   : > { %451 = vst.msk [vmem:[%s699_s26 + $0x18] sm:$0xf] %vm444_vm0, %v584_v47  ;;  %v261_v57 = vadd.f32 %v670_v1, %v222_v49  ;;  %v262_v58 = vadd.f32 %v670_v1, %v223_v50  ;;  %v227_v59 = vmul.f32 %v660_v0, %v188_v46  ;;  %452 = vst.msk [vmem:[%s699_s26 + $0x1c] sm:$0xf] %vm444_vm0, %v585_v52  ;;  %v198_v50 = vld [vmem:[%s665_s20 + $0xc0] sm:$0xff]  ;;  %v200_v52 = vld [vmem:[%s665_s20 + $0xd0] sm:$0xff] }
  0x1d   : > { %v263_v60 = vadd.f32 %v670_v1, %v224_v53  ;;  %v264_v61 = vadd.f32 %v670_v1, %v225_v54  ;;  %v265_v62 = vadd.f32 %v670_v1, %v226_v55  ;;  %v228_v63 = vmul.f32 %v660_v0, %v189_v51  ;;  %v199_v51 = vld [vmem:[%s665_s20 + $0xc8] sm:$0xff] }
  0x1e   : > { %v292_v2 = vmax.f32 %v260_v56, 0.0  ;;  %v293_v3 = vmax.f32 %v261_v57, 0.0  ;;  %v294_v4 = vmax.f32 %v262_v58, 0.0  ;;  %v266_v5 = vadd.f32 %v670_v1, %v227_v59  ;;  %v201_v57 = vld [vmem:[%s665_s20 + $0xd8] sm:$0xff]  ;;  %v202_v58 = vld [vmem:[%s665_s20 + $0xe0] sm:$0xff]  ;;  %v203_v59 = vld [vmem:[%s665_s20 + $0xe8] sm:$0xff] }
  0x1f   : > { %v295_v6 = vmax.f32 %v263_v60, 0.0  ;;  %v296_v7 = vmax.f32 %v264_v61, 0.0  ;;  %v297_v8 = vmax.f32 %v265_v62, 0.0  ;;  %v267_v9 = vadd.f32 %v670_v1, %v228_v63 }
  0x20   : > { %v586_v13 = vpack.c.bf16 %v292_v2, %v292_v2  ;;  %v587_v14 = vpack.c.bf16 %v293_v3, %v293_v3  ;;  %v588_v15 = vpack.c.bf16 %v294_v4, %v294_v4  ;;  %v298_v16 = vmax.f32 %v266_v5, 0.0  ;;  %v204_v2 = vld [vmem:[%s665_s20 + $0xf0] sm:$0xff] }
  0x21   : > { %v589_v20 = vpack.c.bf16 %v295_v6, %v295_v6  ;;  %v590_v21 = vpack.c.bf16 %v296_v7, %v296_v7  ;;  %v591_v22 = vpack.c.bf16 %v297_v8, %v297_v8  ;;  %v299_v23 = vmax.f32 %v267_v9, 0.0  ;;  %v205_v7 = vld [vmem:[%s665_s20 + $0xf8] sm:$0xff] }
  0x22   : > { %453 = vst.msk [vmem:[%s699_s26 + $0x20] sm:$0xf] %vm444_vm0, %v586_v13  ;;  %454 = vst.msk [vmem:[%s699_s26 + $0x24] sm:$0xf] %vm444_vm0, %v587_v14  ;;  %v592_v25 = vpack.c.bf16 %v298_v16, %v298_v16  ;;  %v229_v26 = vmul.f32 %v660_v0, %v190_v10  ;;  %v230_v27 = vmul.f32 %v660_v0, %v191_v11 }
  0x23   : > { %455 = vst.msk [vmem:[%s699_s26 + $0x28] sm:$0xf] %vm444_vm0, %v588_v15  ;;  %v231_v28 = vmul.f32 %v660_v0, %v192_v12  ;;  %456 = vst.msk [vmem:[%s699_s26 + $0x2c] sm:$0xf] %vm444_vm0, %v589_v20  ;;  %v593_v30 = vpack.c.bf16 %v299_v23, %v299_v23  ;;  %v232_v31 = vmul.f32 %v660_v0, %v193_v17 }
  0x24   : > { %457 = vst.msk [vmem:[%s699_s26 + $0x30] sm:$0xf] %vm444_vm0, %v590_v21  ;;  %458 = vst.msk [vmem:[%s699_s26 + $0x34] sm:$0xf] %vm444_vm0, %v591_v22  ;;  %v233_v32 = vmul.f32 %v660_v0, %v194_v18  ;;  %v234_v33 = vmul.f32 %v660_v0, %v195_v19  ;;  %v268_v34 = vadd.f32 %v670_v1, %v229_v26 }
  0x25   : > { %459 = vst.msk [vmem:[%s699_s26 + $0x38] sm:$0xf] %vm444_vm0, %v592_v25  ;;  %v269_v35 = vadd.f32 %v670_v1, %v230_v27  ;;  %v270_v36 = vadd.f32 %v670_v1, %v231_v28  ;;  %v235_v37 = vmul.f32 %v660_v0, %v196_v24  ;;  %460 = vst.msk [vmem:[%s699_s26 + $0x3c] sm:$0xf] %vm444_vm0, %v593_v30 }
  0x26   : > { %v271_v38 = vadd.f32 %v670_v1, %v232_v31  ;;  %v272_v39 = vadd.f32 %v670_v1, %v233_v32  ;;  %v273_v40 = vadd.f32 %v670_v1, %v234_v33  ;;  %v236_v41 = vmul.f32 %v660_v0, %v197_v29 }
  0x27   : > { %v300_v42 = vmax.f32 %v268_v34, 0.0  ;;  %v301_v43 = vmax.f32 %v269_v35, 0.0  ;;  %v302_v44 = vmax.f32 %v270_v36, 0.0  ;;  %v274_v45 = vadd.f32 %v670_v1, %v235_v37 }
  0x28   : > { %v303_v46 = vmax.f32 %v271_v38, 0.0  ;;  %v304_v47 = vmax.f32 %v272_v39, 0.0  ;;  %v305_v48 = vmax.f32 %v273_v40, 0.0  ;;  %v275_v49 = vadd.f32 %v670_v1, %v236_v41 }
  0x29   : > { %v594_v53 = vpack.c.bf16 %v300_v42, %v300_v42  ;;  %v595_v54 = vpack.c.bf16 %v301_v43, %v301_v43  ;;  %v596_v55 = vpack.c.bf16 %v302_v44, %v302_v44  ;;  %v306_v56 = vmax.f32 %v274_v45, 0.0 }
  0x2a   : > { %v597_v60 = vpack.c.bf16 %v303_v46, %v303_v46  ;;  %v598_v61 = vpack.c.bf16 %v304_v47, %v304_v47  ;;  %v599_v62 = vpack.c.bf16 %v305_v48, %v305_v48  ;;  %v307_v63 = vmax.f32 %v275_v49, 0.0 }
  0x2b   : > { %461 = vst.msk [vmem:[%s699_s26 + $0x40] sm:$0xf] %vm444_vm0, %v594_v53  ;;  %462 = vst.msk [vmem:[%s699_s26 + $0x44] sm:$0xf] %vm444_vm0, %v595_v54  ;;  %v600_v3 = vpack.c.bf16 %v306_v56, %v306_v56  ;;  %v237_v4 = vmul.f32 %v660_v0, %v198_v50  ;;  %v238_v5 = vmul.f32 %v660_v0, %v199_v51 }
  0x2c   : > { %463 = vst.msk [vmem:[%s699_s26 + $0x48] sm:$0xf] %vm444_vm0, %v596_v55  ;;  %v239_v6 = vmul.f32 %v660_v0, %v200_v52  ;;  %464 = vst.msk [vmem:[%s699_s26 + $0x4c] sm:$0xf] %vm444_vm0, %v597_v60  ;;  %v601_v8 = vpack.c.bf16 %v307_v63, %v307_v63  ;;  %v240_v9 = vmul.f32 %v660_v0, %v201_v57 }
  0x2d   : > { %465 = vst.msk [vmem:[%s699_s26 + $0x50] sm:$0xf] %vm444_vm0, %v598_v61  ;;  %466 = vst.msk [vmem:[%s699_s26 + $0x54] sm:$0xf] %vm444_vm0, %v599_v62  ;;  %v241_v10 = vmul.f32 %v660_v0, %v202_v58  ;;  %v242_v11 = vmul.f32 %v660_v0, %v203_v59  ;;  %v276_v12 = vadd.f32 %v670_v1, %v237_v4 }
  0x2e   : > { %467 = vst.msk [vmem:[%s699_s26 + $0x58] sm:$0xf] %vm444_vm0, %v600_v3  ;;  %v277_v13 = vadd.f32 %v670_v1, %v238_v5  ;;  %v278_v14 = vadd.f32 %v670_v1, %v239_v6  ;;  %v243_v15 = vmul.f32 %v660_v0, %v204_v2  ;;  %468 = vst.msk [vmem:[%s699_s26 + $0x5c] sm:$0xf] %vm444_vm0, %v601_v8 }
  0x2f   : > { %v279_v16 = vadd.f32 %v670_v1, %v240_v9  ;;  %v280_v17 = vadd.f32 %v670_v1, %v241_v10  ;;  %v281_v18 = vadd.f32 %v670_v1, %v242_v11  ;;  %v244_v19 = vmul.f32 %v660_v0, %v205_v7 }
  0x30   : > { %v308_v20 = vmax.f32 %v276_v12, 0.0  ;;  %v309_v21 = vmax.f32 %v277_v13, 0.0  ;;  %v310_v22 = vmax.f32 %v278_v14, 0.0  ;;  %v282_v23 = vadd.f32 %v670_v1, %v243_v15 }
  0x31   : > { %v311_v24 = vmax.f32 %v279_v16, 0.0  ;;  %v312_v25 = vmax.f32 %v280_v17, 0.0  ;;  %v313_v26 = vmax.f32 %v281_v18, 0.0  ;;  %v283_v27 = vadd.f32 %v670_v1, %v244_v19 }
  0x32   : > { %v602_v28 = vpack.c.bf16 %v308_v20, %v308_v20  ;;  %v603_v29 = vpack.c.bf16 %v309_v21, %v309_v21  ;;  %v604_v0 = vpack.c.bf16 %v310_v22, %v310_v22  ;;  %v314_v30 = vmax.f32 %v282_v23, 0.0 }
  0x33   : > { %v605_v31 = vpack.c.bf16 %v311_v24, %v311_v24  ;;  %v606_v32 = vpack.c.bf16 %v312_v25, %v312_v25  ;;  %v607_v33 = vpack.c.bf16 %v313_v26, %v313_v26  ;;  %v315_v34 = vmax.f32 %v283_v27, 0.0 }
  0x34   : > { %469 = vst.msk [vmem:[%s699_s26 + $0x60] sm:$0xf] %vm444_vm0, %v602_v28  ;;  %470 = vst.msk [vmem:[%s699_s26 + $0x64] sm:$0xf] %vm444_vm0, %v603_v29  ;;  %v608_v35 = vpack.c.bf16 %v314_v30, %v314_v30 }
  0x35   : > { %471 = vst.msk [vmem:[%s699_s26 + $0x68] sm:$0xf] %vm444_vm0, %v604_v0  ;;  %472 = vst.msk [vmem:[%s699_s26 + $0x6c] sm:$0xf] %vm444_vm0, %v605_v31  ;;  %v609_v1 = vpack.c.bf16 %v315_v34, %v315_v34 }
  0x36   : > { %473 = vst.msk [vmem:[%s699_s26 + $0x70] sm:$0xf] %vm444_vm0, %v606_v32  ;;  %474 = vst.msk [vmem:[%s699_s26 + $0x74] sm:$0xf] %vm444_vm0, %v607_v33 }
  0x37   : > { %475 = vst.msk [vmem:[%s699_s26 + $0x78] sm:$0xf] %vm444_vm0, %v608_v35  ;;  %476 = vst.msk [vmem:[%s699_s26 + $0x7c] sm:$0xf] %vm444_vm0, %v609_v1 }
  0x38 PF: > { %s13_s12 = sadd.s32 1, %s624_s12  }
  0x39   : > { %p10_p4 = scmp.ge.s32.totalorder %s13_s12, 4  }
  0x3b   :  { %12 = sbr.rel (!%p10_p4) target bundleno = 1 (0x1), region = 62 }

</bundles_post_ra>
